<compile_context>
chip_gen: v6e
topology: v6e:2x2x1
jax: 0.10.0
libtpu: 0.0.40
codegen_flags: <defaults>
</compile_context>

<pallas_src>
import functools

import jax
import jax.numpy as jnp
from jax.experimental import pallas as pl
from jax.experimental.pallas import tpu as pltpu


def _round_up(x, m):
    return (x + m - 1) // m * m


# ---------------------------------------------------------------------------
# Kernel 1: per-channel sum / sum-of-squares reduction (training-mode stats).
# Output blocks (1, C) stay resident across the grid axis -> accumulator.
# ---------------------------------------------------------------------------
def _bn_stats_kernel(x_ref, sum_ref, sq_ref):
    @pl.when(pl.program_id(0) == 0)
    def _():
        sum_ref[...] = jnp.zeros_like(sum_ref)
        sq_ref[...] = jnp.zeros_like(sq_ref)

    x = x_ref[...].astype(jnp.float32)
    sum_ref[...] += jnp.sum(x, axis=0, keepdims=True)
    sq_ref[...] += jnp.sum(x * x, axis=0, keepdims=True)


@functools.lru_cache(maxsize=None)
def _get_bn_stats(m_pad, c, tm):
    return pl.pallas_call(
        _bn_stats_kernel,
        out_shape=(jax.ShapeDtypeStruct((1, c), jnp.float32),
                   jax.ShapeDtypeStruct((1, c), jnp.float32)),
        grid=(m_pad // tm,),
        in_specs=[pl.BlockSpec((tm, c), lambda i: (i, 0))],
        out_specs=(pl.BlockSpec((1, c), lambda i: (0, 0)),
                   pl.BlockSpec((1, c), lambda i: (0, 0))),
        compiler_params=pltpu.CompilerParams(
            dimension_semantics=("arbitrary",)),
    )


# ---------------------------------------------------------------------------
# Kernel 2: fused affine (folded BN) + ReLU, row-tiled, lane-dense output.
# ---------------------------------------------------------------------------
def _bnrelu_kernel(x_ref, s_ref, b_ref, o_ref):
    x = x_ref[...].astype(jnp.float32)
    y = jnp.maximum(x * s_ref[...] + b_ref[...], 0.0)
    o_ref[...] = y.astype(o_ref.dtype)


@functools.lru_cache(maxsize=None)
def _get_bnrelu(m_pad, c, tm, dtype):
    return pl.pallas_call(
        _bnrelu_kernel,
        out_shape=jax.ShapeDtypeStruct((m_pad, c), dtype),
        grid=(m_pad // tm,),
        in_specs=[pl.BlockSpec((tm, c), lambda i: (i, 0)),
                  pl.BlockSpec((1, c), lambda i: (0, 0)),
                  pl.BlockSpec((1, c), lambda i: (0, 0))],
        out_specs=pl.BlockSpec((tm, c), lambda i: (i, 0)),
        compiler_params=pltpu.CompilerParams(
            dimension_semantics=("parallel",)),
    )


# ---------------------------------------------------------------------------
# Wrapper: mirrors _BatchNormRelu.forward (NCHW in, NCHW out).
# ---------------------------------------------------------------------------
@functools.partial(jax.jit, static_argnames=("training",))
def batchnorm_relu(x_nchw, gamma, beta, running_mean, running_var,
                   eps=1e-5, *, training=True):
    N, C, H, W = x_nchw.shape
    M = N * H * W
    x = jnp.transpose(x_nchw, (0, 2, 3, 1)).reshape(M, C)

    # Row tile: 512 rows (or the whole thing rounded up to a sublane multiple).
    tm = 512 if M >= 512 else _round_up(M, 8)
    m_pad = _round_up(M, tm)
    x_p = jnp.pad(x, ((0, m_pad - M), (0, 0))) if m_pad != M else x

    if training:
        # Batch statistics over (N, H, W) per channel (PyTorch training path).
        s, sq = _get_bn_stats(m_pad, C, tm)(x_p)
        count = jnp.float32(M)
        mean = s[0] / count
        var = sq[0] / count - mean * mean          # biased variance, as used
    else:                                          # for normalization
        mean = running_mean.astype(jnp.float32)
        var = running_var.astype(jnp.float32)

    scale = gamma.astype(jnp.float32) / jnp.sqrt(var + eps)
    bias = beta.astype(jnp.float32) - mean * scale

    out = _get_bnrelu(m_pad, C, tm, x.dtype)(
        x_p, scale.reshape(1, C), bias.reshape(1, C))
    out = out[:M].reshape(N, H, W, C)
    return jnp.transpose(out, (0, 3, 1, 2))


# ---------------------------------------------------------------------------
# Pure-JAX reference for correctness checking.
# ---------------------------------------------------------------------------
def _ref_batchnorm_relu(x, gamma, beta, rmean, rvar, eps=1e-5, training=True):
    if training:
        m = jnp.mean(x, axis=(0, 2, 3), keepdims=True)
        v = jnp.var(x, axis=(0, 2, 3), keepdims=True)
    else:
        m = rmean.reshape(1, -1, 1, 1)
        v = rvar.reshape(1, -1, 1, 1)
    y = (x - m) / jnp.sqrt(v + eps)
    y = y * gamma.reshape(1, -1, 1, 1) + beta.reshape(1, -1, 1, 1)
    return jnp.maximum(y, 0.0)


if __name__ == "__main__":
    key = jax.random.PRNGKey(0)
    kx, kg, kb, km, kv = jax.random.split(key, 5)

    N, C, H, W = 2, 4, 16, 16
    x = jax.random.normal(kx, (N, C, H, W), jnp.float32)
    gamma = 1.0 + 0.1 * jax.random.normal(kg, (C,), jnp.float32)
    beta = 0.1 * jax.random.normal(kb, (C,), jnp.float32)
    running_mean = 0.1 * jax.random.normal(km, (C,), jnp.float32)
    running_var = 1.0 + 0.1 * jnp.abs(jax.random.normal(kv, (C,), jnp.float32))

    # Training mode (PyTorch module default): batch statistics.
    out_train = jax.block_until_ready(
        batchnorm_relu(x, gamma, beta, running_mean, running_var, training=True))
    ref_train = _ref_batchnorm_relu(x, gamma, beta, running_mean, running_var,
                                    training=True)
    assert out_train.shape == (N, C, H, W) and out_train.dtype == jnp.float32
    assert jnp.allclose(out_train, ref_train, atol=1e-4, rtol=1e-4), (
        float(jnp.max(jnp.abs(out_train - ref_train))))

    # Eval mode: folded running statistics.
    out_eval = jax.block_until_ready(
        batchnorm_relu(x, gamma, beta, running_mean, running_var, training=False))
    ref_eval = _ref_batchnorm_relu(x, gamma, beta, running_mean, running_var,
                                   training=False)
    assert out_eval.shape == (N, C, H, W) and out_eval.dtype == jnp.float32
    assert jnp.allclose(out_eval, ref_eval, atol=1e-4, rtol=1e-4), (
        float(jnp.max(jnp.abs(out_eval - ref_eval))))

    print("KERNEL_OK")
</pallas_src>

<mosaic_0001>
module attributes {stable_mosaic.version = 11 : i64} {
  func.func @_bnrelu_kernel(%arg0: i32, %arg1: memref<512x4xf32, #tpu.memory_space<vmem>>, %arg2: memref<1x4xf32, #tpu.memory_space<vmem>>, %arg3: memref<1x4xf32, #tpu.memory_space<vmem>>, %arg4: memref<512x4xf32, #tpu.memory_space<vmem>>) attributes {dimension_semantics = [#tpu.dimension_semantics<parallel>], iteration_bounds = array<i64: 1>, scalar_prefetch = 0 : i64, scratch_operands = 0 : i64, tpu.core_type = #tpu.core_type<tc>, window_params = [{transform_indices = @transform_0, window_bounds = array<i64: 512, 4>}, {pipeline_mode = #tpu.pipeline_mode<synchronous>, transform_indices = @transform_1, window_bounds = array<i64: 1, 4>}, {pipeline_mode = #tpu.pipeline_mode<synchronous>, transform_indices = @transform_2, window_bounds = array<i64: 1, 4>}, {transform_indices = @transform_3, window_bounds = array<i64: 512, 4>}]} {
    %c0 = arith.constant 0 : index
    %c0_0 = arith.constant 0 : index
    %0 = vector.load %arg1[%c0, %c0_0] : memref<512x4xf32, #tpu.memory_space<vmem>>, vector<512x4xf32>
    %c0_1 = arith.constant 0 : index
    %c0_2 = arith.constant 0 : index
    %1 = vector.load %arg2[%c0_1, %c0_2] : memref<1x4xf32, #tpu.memory_space<vmem>>, vector<1x4xf32>
    %2 = vector.broadcast %1 : vector<1x4xf32> to vector<512x4xf32>
    %3 = arith.mulf %0, %2 : vector<512x4xf32>
    %c0_3 = arith.constant 0 : index
    %c0_4 = arith.constant 0 : index
    %4 = vector.load %arg3[%c0_3, %c0_4] : memref<1x4xf32, #tpu.memory_space<vmem>>, vector<1x4xf32>
    %5 = vector.broadcast %4 : vector<1x4xf32> to vector<512x4xf32>
    %6 = arith.addf %3, %5 : vector<512x4xf32>
    %cst = arith.constant 0.000000e+00 : f32
    %7 = vector.broadcast %cst : f32 to vector<512x4xf32>
    %8 = arith.maximumf %6, %7 : vector<512x4xf32>
    %c0_5 = arith.constant 0 : index
    %c0_6 = arith.constant 0 : index
    %9 = vector.load %arg4[%c0_5, %c0_6] : memref<512x4xf32, #tpu.memory_space<vmem>>, vector<512x4xf32>
    tpu.vector_store %arg4[%c0_5, %c0_6], %8 {strides = array<i32>} : memref<512x4xf32, #tpu.memory_space<vmem>>, vector<512x4xf32>,
    return
  }
  func.func @transform_0(%arg0: i32) -> (i32, i32) {
    %c0_i32 = arith.constant 0 : i32
    %c0_i32_0 = arith.constant 0 : i32
    return %arg0, %c0_i32 : i32, i32
  }
  func.func @transform_1(%arg0: i32) -> (i32, i32) {
    %c0_i32 = arith.constant 0 : i32
    %c0_i32_0 = arith.constant 0 : i32
    %c0_i32_1 = arith.constant 0 : i32
    return %c0_i32, %c0_i32_0 : i32, i32
  }
  func.func @transform_2(%arg0: i32) -> (i32, i32) {
    %c0_i32 = arith.constant 0 : i32
    %c0_i32_0 = arith.constant 0 : i32
    %c0_i32_1 = arith.constant 0 : i32
    return %c0_i32, %c0_i32_0 : i32, i32
  }
  func.func @transform_3(%arg0: i32) -> (i32, i32) {
    %c0_i32 = arith.constant 0 : i32
    %c0_i32_0 = arith.constant 0 : i32
    return %arg0, %c0_i32 : i32, i32
  }
}

module attributes {stable_mosaic.version = 11 : i64} {
  func.func @_bn_stats_kernel(%arg0: i32, %arg1: memref<512x4xf32, #tpu.memory_space<vmem>>, %arg2: memref<1x4xf32, #tpu.memory_space<vmem>>, %arg3: memref<1x4xf32, #tpu.memory_space<vmem>>) attributes {dimension_semantics = [#tpu.dimension_semantics<arbitrary>], iteration_bounds = array<i64: 1>, scalar_prefetch = 0 : i64, scratch_operands = 0 : i64, tpu.core_type = #tpu.core_type<tc>, window_params = [{transform_indices = @transform_0, window_bounds = array<i64: 512, 4>}, {pipeline_mode = #tpu.pipeline_mode<synchronous>, transform_indices = @transform_1, window_bounds = array<i64: 1, 4>}, {pipeline_mode = #tpu.pipeline_mode<synchronous>, transform_indices = @transform_2, window_bounds = array<i64: 1, 4>}]} {
    %c0_i32 = arith.constant 0 : i32
    %0 = arith.cmpi eq, %arg0, %c0_i32 : i32
    %1 = arith.extui %0 : i1 to i32
    %c0_i32_0 = arith.constant 0 : i32
    %2 = arith.cmpi ne, %1, %c0_i32_0 : i32
    scf.if %2 {
      %cst_11 = arith.constant 0.000000e+00 : f32
      %15 = vector.broadcast %cst_11 : f32 to vector<1x4xf32>
      %c0_12 = arith.constant 0 : index
      %c0_13 = arith.constant 0 : index
      %16 = vector.load %arg2[%c0_12, %c0_13] : memref<1x4xf32, #tpu.memory_space<vmem>>, vector<1x4xf32>
      tpu.vector_store %arg2[%c0_12, %c0_13], %15 {strides = array<i32>} : memref<1x4xf32, #tpu.memory_space<vmem>>, vector<1x4xf32>,
      %cst_14 = arith.constant 0.000000e+00 : f32
      %17 = vector.broadcast %cst_14 : f32 to vector<1x4xf32>
      %c0_15 = arith.constant 0 : index
      %c0_16 = arith.constant 0 : index
      %18 = vector.load %arg3[%c0_15, %c0_16] : memref<1x4xf32, #tpu.memory_space<vmem>>, vector<1x4xf32>
      tpu.vector_store %arg3[%c0_15, %c0_16], %17 {strides = array<i32>} : memref<1x4xf32, #tpu.memory_space<vmem>>, vector<1x4xf32>,
    } else {
    }
    %c0 = arith.constant 0 : index
    %c0_1 = arith.constant 0 : index
    %3 = vector.load %arg1[%c0, %c0_1] : memref<512x4xf32, #tpu.memory_space<vmem>>, vector<512x4xf32>
    %c0_2 = arith.constant 0 : index
    %c0_3 = arith.constant 0 : index
    %4 = vector.load %arg2[%c0_2, %c0_3] : memref<1x4xf32, #tpu.memory_space<vmem>>, vector<1x4xf32>
    %cst = arith.constant dense<0.000000e+00> : vector<4xf32>
    %5 = vector.multi_reduction <add>, %3, %cst [0] : vector<512x4xf32> to vector<4xf32>
    %6 = vector.shape_cast %5 : vector<4xf32> to vector<1x4xf32>
    %7 = arith.addf %4, %6 : vector<1x4xf32>
    %c0_4 = arith.constant 0 : index
    %c0_5 = arith.constant 0 : index
    %8 = vector.load %arg2[%c0_4, %c0_5] : memref<1x4xf32, #tpu.memory_space<vmem>>, vector<1x4xf32>
    tpu.vector_store %arg2[%c0_4, %c0_5], %7 {strides = array<i32>} : memref<1x4xf32, #tpu.memory_space<vmem>>, vector<1x4xf32>,
    %c0_6 = arith.constant 0 : index
    %c0_7 = arith.constant 0 : index
    %9 = vector.load %arg3[%c0_6, %c0_7] : memref<1x4xf32, #tpu.memory_space<vmem>>, vector<1x4xf32>
    %10 = arith.mulf %3, %3 : vector<512x4xf32>
    %cst_8 = arith.constant dense<0.000000e+00> : vector<4xf32>
    %11 = vector.multi_reduction <add>, %10, %cst_8 [0] : vector<512x4xf32> to vector<4xf32>
    %12 = vector.shape_cast %11 : vector<4xf32> to vector<1x4xf32>
    %13 = arith.addf %9, %12 : vector<1x4xf32>
    %c0_9 = arith.constant 0 : index
    %c0_10 = arith.constant 0 : index
    %14 = vector.load %arg3[%c0_9, %c0_10] : memref<1x4xf32, #tpu.memory_space<vmem>>, vector<1x4xf32>
    tpu.vector_store %arg3[%c0_9, %c0_10], %13 {strides = array<i32>} : memref<1x4xf32, #tpu.memory_space<vmem>>, vector<1x4xf32>,
    return
  }
  func.func @transform_0(%arg0: i32) -> (i32, i32) {
    %c0_i32 = arith.constant 0 : i32
    %c0_i32_0 = arith.constant 0 : i32
    return %arg0, %c0_i32 : i32, i32
  }
  func.func @transform_1(%arg0: i32) -> (i32, i32) {
    %c0_i32 = arith.constant 0 : i32
    %c0_i32_0 = arith.constant 0 : i32
    %c0_i32_1 = arith.constant 0 : i32
    return %c0_i32, %c0_i32_0 : i32, i32
  }
  func.func @transform_2(%arg0: i32) -> (i32, i32) {
    %c0_i32 = arith.constant 0 : i32
    %c0_i32_0 = arith.constant 0 : i32
    %c0_i32_1 = arith.constant 0 : i32
    return %c0_i32, %c0_i32_0 : i32, i32
  }
}

</mosaic_0001>

<bundles_post_ra>
// kernel: batchnorm_relu.3
= control target key start
LH: loop header
LB: loop body
LE: loop exit
PB: predicated region body
PF: predicated region fallthrough
CT: control target
= control target key end

     0   :  { %vm284_vm0 = vcmask 31744   ;;  %s961_s0 = inlined_call_operand.vmem [shape: f32[512,4], index: 0, kind: input, shape index: {}]   ;;  %s962_s1 = inlined_call_operand.vmem [shape: f32[1,4], index: 1, kind: input, shape index: {}]   ;;  %s963_s2 = inlined_call_operand.vmem [shape: f32[1,4], index: 2, kind: input, shape index: {}]   ;;  %s964_s3 = inlined_call_operand.vmem [shape: f32[512,4], index: 3, kind: output, shape index: {}]  }
   0x1   :  { %v14_v0 = vld [vmem:[%s961_s0] sm:$0xff]  ;;  %v15_v4 = vld [vmem:[%s961_s0 + $0x8] sm:$0xff]  ;;  %v16_v5 = vld [vmem:[%s961_s0 + $0x10] sm:$0xff] }
   0x2   :  { %v381_v1 = vld [vmem:[%s962_s1] ss:$0 sm:$0xff]  ;;  %v17_v6 = vld [vmem:[%s961_s0 + $0x18] sm:$0xff]  ;;  %v19_v11 = vld [vmem:[%s961_s0 + $0x28] sm:$0xff] }
   0x3   :  { %v386_v2 = vld [vmem:[%s963_s2] ss:$0 sm:$0xff]  ;;  %v85_v3 = vmul.f32 %v381_v1, %v14_v0  ;;  %v86_v7 = vmul.f32 %v381_v1, %v15_v4  ;;  %v87_v8 = vmul.f32 %v381_v1, %v16_v5  ;;  %v88_v9 = vmul.f32 %v381_v1, %v17_v6  ;;  %v20_v12 = vld [vmem:[%s961_s0 + $0x30] sm:$0xff]  ;;  %v21_v17 = vld [vmem:[%s961_s0 + $0x38] sm:$0xff] }
   0x4   :  { %v18_v10 = vld [vmem:[%s961_s0 + $0x20] sm:$0xff]  ;;  %v90_v15 = vmul.f32 %v381_v1, %v19_v11  ;;  %v91_v16 = vmul.f32 %v381_v1, %v20_v12  ;;  %v92_v21 = vmul.f32 %v381_v1, %v21_v17  ;;  %v23_v27 = vld [vmem:[%s961_s0 + $0x48] sm:$0xff]  ;;  %v24_v28 = vld [vmem:[%s961_s0 + $0x50] sm:$0xff] }
   0x5   :  { %v156_v13 = vadd.f32 %v386_v2, %v85_v3  ;;  %v89_v14 = vmul.f32 %v381_v1, %v18_v10  ;;  %v157_v18 = vadd.f32 %v386_v2, %v86_v7  ;;  %v158_v19 = vadd.f32 %v386_v2, %v87_v8  ;;  %v22_v22 = vld [vmem:[%s961_s0 + $0x40] sm:$0xff]  ;;  %v25_v29 = vld [vmem:[%s961_s0 + $0x58] sm:$0xff]  ;;  %v27_v35 = vld [vmem:[%s961_s0 + $0x68] sm:$0xff] }
   0x6   :  { %v159_v20 = vadd.f32 %v386_v2, %v88_v9  ;;  %v161_v25 = vadd.f32 %v386_v2, %v90_v15  ;;  %v162_v26 = vadd.f32 %v386_v2, %v91_v16  ;;  %v163_v33 = vadd.f32 %v386_v2, %v92_v21  ;;  %v26_v34 = vld [vmem:[%s961_s0 + $0x60] sm:$0xff]  ;;  %v28_v36 = vld [vmem:[%s961_s0 + $0x70] sm:$0xff]  ;;  %v29_v41 = vld [vmem:[%s961_s0 + $0x78] sm:$0xff] }
   0x7   :  { %v220_v23 = vmax.f32 %v156_v13, 0.0  ;;  %v160_v24 = vadd.f32 %v386_v2, %v89_v14  ;;  %v221_v30 = vmax.f32 %v157_v18, 0.0  ;;  %v222_v31 = vmax.f32 %v158_v19, 0.0  ;;  %v30_v54 = vld [vmem:[%s961_s0 + $0x80] sm:$0xff]  ;;  %v31_v59 = vld [vmem:[%s961_s0 + $0x88] sm:$0xff]  ;;  %v32_v60 = vld [vmem:[%s961_s0 + $0x90] sm:$0xff] }
   0x8   :  { %v223_v32 = vmax.f32 %v159_v20, 0.0  ;;  %v225_v38 = vmax.f32 %v161_v25, 0.0  ;;  %v226_v39 = vmax.f32 %v162_v26, 0.0  ;;  %v93_v40 = vmul.f32 %v381_v1, %v22_v22  ;;  %v33_v61 = vld [vmem:[%s961_s0 + $0x98] sm:$0xff]  ;;  %v34_v4 = vld [vmem:[%s961_s0 + $0xa0] sm:$0xff]  ;;  %v35_v5 = vld [vmem:[%s961_s0 + $0xa8] sm:$0xff] }
   0x9   :  { %285 = vst.msk [vmem:[%s964_s3] sm:$0xff] %vm284_vm0, %v220_v23  ;;  %v224_v37 = vmax.f32 %v160_v24, 0.0  ;;  %286 = vst.msk [vmem:[%s964_s3 + $0x8] sm:$0xff] %vm284_vm0, %v221_v30  ;;  %v227_v42 = vmax.f32 %v163_v33, 0.0  ;;  %v94_v43 = vmul.f32 %v381_v1, %v23_v27  ;;  %v95_v44 = vmul.f32 %v381_v1, %v24_v28  ;;  %v36_v6 = vld [vmem:[%s961_s0 + $0xb0] sm:$0xff]  ;;  %v37_v11 = vld [vmem:[%s961_s0 + $0xb8] sm:$0xff] }
   0xa   :  { %287 = vst.msk [vmem:[%s964_s3 + $0x10] sm:$0xff] %vm284_vm0, %v222_v31  ;;  %288 = vst.msk [vmem:[%s964_s3 + $0x18] sm:$0xff] %vm284_vm0, %v223_v32  ;;  %v96_v45 = vmul.f32 %v381_v1, %v25_v29  ;;  %v164_v46 = vadd.f32 %v386_v2, %v93_v40  ;;  %v97_v47 = vmul.f32 %v381_v1, %v26_v34  ;;  %v38_v24 = vld [vmem:[%s961_s0 + $0xc0] sm:$0xff]  ;;  %v39_v29 = vld [vmem:[%s961_s0 + $0xc8] sm:$0xff] }
   0xb   :  { %289 = vst.msk [vmem:[%s964_s3 + $0x20] sm:$0xff] %vm284_vm0, %v224_v37  ;;  %290 = vst.msk [vmem:[%s964_s3 + $0x28] sm:$0xff] %vm284_vm0, %v225_v38  ;;  %v98_v48 = vmul.f32 %v381_v1, %v27_v35  ;;  %v99_v49 = vmul.f32 %v381_v1, %v28_v36  ;;  %v165_v50 = vadd.f32 %v386_v2, %v94_v43  ;;  %v40_v30 = vld [vmem:[%s961_s0 + $0xd0] sm:$0xff]  ;;  %v41_v31 = vld [vmem:[%s961_s0 + $0xd8] sm:$0xff] }
   0xc   :  { %291 = vst.msk [vmem:[%s964_s3 + $0x30] sm:$0xff] %vm284_vm0, %v226_v39  ;;  %292 = vst.msk [vmem:[%s964_s3 + $0x38] sm:$0xff] %vm284_vm0, %v227_v42  ;;  %v166_v51 = vadd.f32 %v386_v2, %v95_v44  ;;  %v167_v52 = vadd.f32 %v386_v2, %v96_v45  ;;  %v100_v53 = vmul.f32 %v381_v1, %v29_v41  ;;  %v228_v55 = vmax.f32 %v164_v46, 0.0  ;;  %v42_v36 = vld [vmem:[%s961_s0 + $0xe0] sm:$0xff]  ;;  %v43_v37 = vld [vmem:[%s961_s0 + $0xe8] sm:$0xff] }
   0xd   :  { %v168_v56 = vadd.f32 %v386_v2, %v97_v47  ;;  %v169_v57 = vadd.f32 %v386_v2, %v98_v48  ;;  %v170_v58 = vadd.f32 %v386_v2, %v99_v49  ;;  %v229_v62 = vmax.f32 %v165_v50, 0.0  ;;  %v44_v38 = vld [vmem:[%s961_s0 + $0xf0] sm:$0xff]  ;;  %v45_v43 = vld [vmem:[%s961_s0 + $0xf8] sm:$0xff] }
   0xe   :  { %v230_v63 = vmax.f32 %v166_v51, 0.0  ;;  %v231_v0 = vmax.f32 %v167_v52, 0.0  ;;  %v171_v3 = vadd.f32 %v386_v2, %v100_v53  ;;  %293 = vst.msk [vmem:[%s964_s3 + $0x40] sm:$0xff] %vm284_vm0, %v228_v55  ;;  %v101_v10 = vmul.f32 %v381_v1, %v30_v54 }
   0xf   :  { %v232_v7 = vmax.f32 %v168_v56, 0.0  ;;  %v233_v8 = vmax.f32 %v169_v57, 0.0  ;;  %v234_v9 = vmax.f32 %v170_v58, 0.0  ;;  %294 = vst.msk [vmem:[%s964_s3 + $0x48] sm:$0xff] %vm284_vm0, %v229_v62  ;;  %v102_v13 = vmul.f32 %v381_v1, %v31_v59  ;;  %v46_v56 = vld [vmem:[%s961_s0 + $0x100] sm:$0xff]  ;;  %v48_v62 = vld [vmem:[%s961_s0 + $0x110] sm:$0xff] }
  0x10   :  { %295 = vst.msk [vmem:[%s964_s3 + $0x50] sm:$0xff] %vm284_vm0, %v230_v63  ;;  %296 = vst.msk [vmem:[%s964_s3 + $0x58] sm:$0xff] %vm284_vm0, %v231_v0  ;;  %v235_v12 = vmax.f32 %v171_v3, 0.0  ;;  %v103_v14 = vmul.f32 %v381_v1, %v32_v60  ;;  %v104_v15 = vmul.f32 %v381_v1, %v33_v61  ;;  %v172_v16 = vadd.f32 %v386_v2, %v101_v10  ;;  %v47_v61 = vld [vmem:[%s961_s0 + $0x108] sm:$0xff]  ;;  %v49_v63 = vld [vmem:[%s961_s0 + $0x118] sm:$0xff] }
  0x11   :  { %297 = vst.msk [vmem:[%s964_s3 + $0x60] sm:$0xff] %vm284_vm0, %v232_v7  ;;  %298 = vst.msk [vmem:[%s964_s3 + $0x68] sm:$0xff] %vm284_vm0, %v233_v8  ;;  %v105_v17 = vmul.f32 %v381_v1, %v34_v4  ;;  %v106_v18 = vmul.f32 %v381_v1, %v35_v5  ;;  %v107_v19 = vmul.f32 %v381_v1, %v36_v6  ;;  %v50_v6 = vld [vmem:[%s961_s0 + $0x120] sm:$0xff]  ;;  %v51_v7 = vld [vmem:[%s961_s0 + $0x128] sm:$0xff] }
  0x12   :  { %299 = vst.msk [vmem:[%s964_s3 + $0x70] sm:$0xff] %vm284_vm0, %v234_v9  ;;  %300 = vst.msk [vmem:[%s964_s3 + $0x78] sm:$0xff] %vm284_vm0, %v235_v12  ;;  %v173_v20 = vadd.f32 %v386_v2, %v102_v13  ;;  %v174_v21 = vadd.f32 %v386_v2, %v103_v14  ;;  %v175_v22 = vadd.f32 %v386_v2, %v104_v15  ;;  %v236_v25 = vmax.f32 %v172_v16, 0.0  ;;  %v52_v8 = vld [vmem:[%s961_s0 + $0x130] sm:$0xff]  ;;  %v53_v13 = vld [vmem:[%s961_s0 + $0x138] sm:$0xff] }
  0x13   :  { %v108_v23 = vmul.f32 %v381_v1, %v37_v11  ;;  %v176_v26 = vadd.f32 %v386_v2, %v105_v17  ;;  %v177_v27 = vadd.f32 %v386_v2, %v106_v18  ;;  %v178_v28 = vadd.f32 %v386_v2, %v107_v19 }
  0x14   :  { %v237_v32 = vmax.f32 %v173_v20, 0.0  ;;  %v238_v33 = vmax.f32 %v174_v21, 0.0  ;;  %v239_v34 = vmax.f32 %v175_v22, 0.0  ;;  %301 = vst.msk [vmem:[%s964_s3 + $0x80] sm:$0xff] %vm284_vm0, %v236_v25  ;;  %v109_v42 = vmul.f32 %v381_v1, %v38_v24 }
  0x15   :  { %v179_v35 = vadd.f32 %v386_v2, %v108_v23  ;;  %v240_v39 = vmax.f32 %v176_v26, 0.0  ;;  %v241_v40 = vmax.f32 %v177_v27, 0.0  ;;  %v242_v41 = vmax.f32 %v178_v28, 0.0  ;;  %v54_v26 = vld [vmem:[%s961_s0 + $0x140] sm:$0xff] }
  0x16   :  { %302 = vst.msk [vmem:[%s964_s3 + $0x88] sm:$0xff] %vm284_vm0, %v237_v32  ;;  %303 = vst.msk [vmem:[%s964_s3 + $0x90] sm:$0xff] %vm284_vm0, %v238_v33  ;;  %v110_v45 = vmul.f32 %v381_v1, %v39_v29  ;;  %v111_v46 = vmul.f32 %v381_v1, %v40_v30  ;;  %v112_v47 = vmul.f32 %v381_v1, %v41_v31  ;;  %v55_v31 = vld [vmem:[%s961_s0 + $0x148] sm:$0xff]  ;;  %v56_v32 = vld [vmem:[%s961_s0 + $0x150] sm:$0xff] }
  0x17   :  { %304 = vst.msk [vmem:[%s964_s3 + $0x98] sm:$0xff] %vm284_vm0, %v239_v34  ;;  %v243_v44 = vmax.f32 %v179_v35, 0.0  ;;  %305 = vst.msk [vmem:[%s964_s3 + $0xa0] sm:$0xff] %vm284_vm0, %v240_v39  ;;  %v180_v48 = vadd.f32 %v386_v2, %v109_v42  ;;  %v113_v49 = vmul.f32 %v381_v1, %v42_v36  ;;  %v114_v50 = vmul.f32 %v381_v1, %v43_v37  ;;  %v57_v33 = vld [vmem:[%s961_s0 + $0x158] sm:$0xff]  ;;  %v59_v39 = vld [vmem:[%s961_s0 + $0x168] sm:$0xff] }
  0x18   :  { %306 = vst.msk [vmem:[%s964_s3 + $0xa8] sm:$0xff] %vm284_vm0, %v241_v40  ;;  %307 = vst.msk [vmem:[%s964_s3 + $0xb0] sm:$0xff] %vm284_vm0, %v242_v41  ;;  %v115_v51 = vmul.f32 %v381_v1, %v44_v38  ;;  %v181_v52 = vadd.f32 %v386_v2, %v110_v45  ;;  %v182_v53 = vadd.f32 %v386_v2, %v111_v46  ;;  %v58_v38 = vld [vmem:[%s961_s0 + $0x160] sm:$0xff]  ;;  %v60_v40 = vld [vmem:[%s961_s0 + $0x170] sm:$0xff] }
  0x19   :  { %308 = vst.msk [vmem:[%s964_s3 + $0xb8] sm:$0xff] %vm284_vm0, %v243_v44  ;;  %v183_v54 = vadd.f32 %v386_v2, %v112_v47  ;;  %v116_v55 = vmul.f32 %v381_v1, %v45_v43  ;;  %v244_v57 = vmax.f32 %v180_v48, 0.0  ;;  %v184_v58 = vadd.f32 %v386_v2, %v113_v49  ;;  %v61_v45 = vld [vmem:[%s961_s0 + $0x178] sm:$0xff] }
  0x1a   :  { %v185_v59 = vadd.f32 %v386_v2, %v114_v50  ;;  %v186_v60 = vadd.f32 %v386_v2, %v115_v51  ;;  %v245_v0 = vmax.f32 %v181_v52, 0.0  ;;  %v246_v3 = vmax.f32 %v182_v53, 0.0 }
  0x1b   :  { %v247_v4 = vmax.f32 %v183_v54, 0.0  ;;  %v187_v5 = vadd.f32 %v386_v2, %v116_v55  ;;  %309 = vst.msk [vmem:[%s964_s3 + $0xc0] sm:$0xff] %vm284_vm0, %v244_v57  ;;  %v248_v9 = vmax.f32 %v184_v58, 0.0  ;;  %v117_v12 = vmul.f32 %v381_v1, %v46_v56  ;;  %v62_v58 = vld [vmem:[%s961_s0 + $0x180] sm:$0xff] }
  0x1c   :  { %v249_v10 = vmax.f32 %v185_v59, 0.0  ;;  %v250_v11 = vmax.f32 %v186_v60, 0.0  ;;  %310 = vst.msk [vmem:[%s964_s3 + $0xc8] sm:$0xff] %vm284_vm0, %v245_v0  ;;  %311 = vst.msk [vmem:[%s964_s3 + $0xd0] sm:$0xff] %vm284_vm0, %v246_v3  ;;  %v118_v15 = vmul.f32 %v381_v1, %v47_v61  ;;  %v119_v16 = vmul.f32 %v381_v1, %v48_v62  ;;  %v64_v0 = vld [vmem:[%s961_s0 + $0x190] sm:$0xff]  ;;  %v65_v3 = vld [vmem:[%s961_s0 + $0x198] sm:$0xff] }
  0x1d   :  { %312 = vst.msk [vmem:[%s964_s3 + $0xd8] sm:$0xff] %vm284_vm0, %v247_v4  ;;  %v251_v14 = vmax.f32 %v187_v5, 0.0  ;;  %v120_v17 = vmul.f32 %v381_v1, %v49_v63  ;;  %313 = vst.msk [vmem:[%s964_s3 + $0xe0] sm:$0xff] %vm284_vm0, %v248_v9  ;;  %v188_v18 = vadd.f32 %v386_v2, %v117_v12  ;;  %v121_v19 = vmul.f32 %v381_v1, %v50_v6  ;;  %v63_v63 = vld [vmem:[%s961_s0 + $0x188] sm:$0xff] }
  0x1e   :  { %314 = vst.msk [vmem:[%s964_s3 + $0xe8] sm:$0xff] %vm284_vm0, %v249_v10  ;;  %315 = vst.msk [vmem:[%s964_s3 + $0xf0] sm:$0xff] %vm284_vm0, %v250_v11  ;;  %v122_v20 = vmul.f32 %v381_v1, %v51_v7  ;;  %v123_v21 = vmul.f32 %v381_v1, %v52_v8  ;;  %v189_v22 = vadd.f32 %v386_v2, %v118_v15  ;;  %v66_v8 = vld [vmem:[%s961_s0 + $0x1a0] sm:$0xff]  ;;  %v67_v9 = vld [vmem:[%s961_s0 + $0x1a8] sm:$0xff] }
  0x1f   :  { %316 = vst.msk [vmem:[%s964_s3 + $0xf8] sm:$0xff] %vm284_vm0, %v251_v14  ;;  %v190_v23 = vadd.f32 %v386_v2, %v119_v16  ;;  %v191_v24 = vadd.f32 %v386_v2, %v120_v17  ;;  %v124_v25 = vmul.f32 %v381_v1, %v53_v13  ;;  %v252_v27 = vmax.f32 %v188_v18, 0.0  ;;  %v68_v10 = vld [vmem:[%s961_s0 + $0x1b0] sm:$0xff]  ;;  %v69_v15 = vld [vmem:[%s961_s0 + $0x1b8] sm:$0xff] }
  0x20   :  { %v192_v28 = vadd.f32 %v386_v2, %v121_v19  ;;  %v193_v29 = vadd.f32 %v386_v2, %v122_v20  ;;  %v194_v30 = vadd.f32 %v386_v2, %v123_v21  ;;  %v253_v34 = vmax.f32 %v189_v22, 0.0 }
  0x21   :  { %v254_v35 = vmax.f32 %v190_v23, 0.0  ;;  %v255_v36 = vmax.f32 %v191_v24, 0.0  ;;  %v195_v37 = vadd.f32 %v386_v2, %v124_v25  ;;  %317 = vst.msk [vmem:[%s964_s3 + $0x100] sm:$0xff] %vm284_vm0, %v252_v27  ;;  %v125_v44 = vmul.f32 %v381_v1, %v54_v26 }
  0x22   :  { %v256_v41 = vmax.f32 %v192_v28, 0.0  ;;  %v257_v42 = vmax.f32 %v193_v29, 0.0  ;;  %v258_v43 = vmax.f32 %v194_v30, 0.0  ;;  %318 = vst.msk [vmem:[%s964_s3 + $0x108] sm:$0xff] %vm284_vm0, %v253_v34  ;;  %v126_v47 = vmul.f32 %v381_v1, %v55_v31  ;;  %v70_v28 = vld [vmem:[%s961_s0 + $0x1c0] sm:$0xff]  ;;  %v72_v34 = vld [vmem:[%s961_s0 + $0x1d0] sm:$0xff] }
  0x23   :  { %319 = vst.msk [vmem:[%s964_s3 + $0x110] sm:$0xff] %vm284_vm0, %v254_v35  ;;  %320 = vst.msk [vmem:[%s964_s3 + $0x118] sm:$0xff] %vm284_vm0, %v255_v36  ;;  %v259_v46 = vmax.f32 %v195_v37, 0.0  ;;  %v127_v48 = vmul.f32 %v381_v1, %v56_v32  ;;  %v128_v49 = vmul.f32 %v381_v1, %v57_v33  ;;  %v196_v50 = vadd.f32 %v386_v2, %v125_v44  ;;  %v71_v33 = vld [vmem:[%s961_s0 + $0x1c8] sm:$0xff]  ;;  %v73_v35 = vld [vmem:[%s961_s0 + $0x1d8] sm:$0xff] }
  0x24   :  { %321 = vst.msk [vmem:[%s964_s3 + $0x120] sm:$0xff] %vm284_vm0, %v256_v41  ;;  %322 = vst.msk [vmem:[%s964_s3 + $0x128] sm:$0xff] %vm284_vm0, %v257_v42  ;;  %v129_v51 = vmul.f32 %v381_v1, %v58_v38  ;;  %v130_v52 = vmul.f32 %v381_v1, %v59_v39  ;;  %v131_v53 = vmul.f32 %v381_v1, %v60_v40  ;;  %v74_v40 = vld [vmem:[%s961_s0 + $0x1e0] sm:$0xff]  ;;  %v75_v41 = vld [vmem:[%s961_s0 + $0x1e8] sm:$0xff] }
  0x25   :  { %323 = vst.msk [vmem:[%s964_s3 + $0x130] sm:$0xff] %vm284_vm0, %v258_v43  ;;  %324 = vst.msk [vmem:[%s964_s3 + $0x138] sm:$0xff] %vm284_vm0, %v259_v46  ;;  %v197_v54 = vadd.f32 %v386_v2, %v126_v47  ;;  %v198_v55 = vadd.f32 %v386_v2, %v127_v48  ;;  %v199_v56 = vadd.f32 %v386_v2, %v128_v49  ;;  %v260_v59 = vmax.f32 %v196_v50, 0.0  ;;  %v76_v42 = vld [vmem:[%s961_s0 + $0x1f0] sm:$0xff]  ;;  %v77_v47 = vld [vmem:[%s961_s0 + $0x1f8] sm:$0xff] }
  0x26   :  { %v132_v57 = vmul.f32 %v381_v1, %v61_v45  ;;  %v200_v60 = vadd.f32 %v386_v2, %v129_v51  ;;  %v201_v61 = vadd.f32 %v386_v2, %v130_v52  ;;  %v202_v62 = vadd.f32 %v386_v2, %v131_v53 }
  0x27   :  { %v261_v4 = vmax.f32 %v197_v54, 0.0  ;;  %v262_v5 = vmax.f32 %v198_v55, 0.0  ;;  %v263_v6 = vmax.f32 %v199_v56, 0.0  ;;  %325 = vst.msk [vmem:[%s964_s3 + $0x140] sm:$0xff] %vm284_vm0, %v260_v59  ;;  %v133_v14 = vmul.f32 %v381_v1, %v62_v58 }
  0x28   :  { %v203_v7 = vadd.f32 %v386_v2, %v132_v57  ;;  %v264_v11 = vmax.f32 %v200_v60, 0.0  ;;  %v265_v12 = vmax.f32 %v201_v61, 0.0  ;;  %v266_v13 = vmax.f32 %v202_v62, 0.0 }
  0x29   :  { %326 = vst.msk [vmem:[%s964_s3 + $0x148] sm:$0xff] %vm284_vm0, %v261_v4  ;;  %327 = vst.msk [vmem:[%s964_s3 + $0x150] sm:$0xff] %vm284_vm0, %v262_v5  ;;  %v134_v17 = vmul.f32 %v381_v1, %v63_v63  ;;  %v135_v18 = vmul.f32 %v381_v1, %v64_v0  ;;  %v136_v19 = vmul.f32 %v381_v1, %v65_v3 }
  0x2a   :  { %328 = vst.msk [vmem:[%s964_s3 + $0x158] sm:$0xff] %vm284_vm0, %v263_v6  ;;  %v267_v16 = vmax.f32 %v203_v7, 0.0  ;;  %329 = vst.msk [vmem:[%s964_s3 + $0x160] sm:$0xff] %vm284_vm0, %v264_v11  ;;  %v204_v20 = vadd.f32 %v386_v2, %v133_v14  ;;  %v137_v21 = vmul.f32 %v381_v1, %v66_v8  ;;  %v138_v22 = vmul.f32 %v381_v1, %v67_v9 }
  0x2b   :  { %330 = vst.msk [vmem:[%s964_s3 + $0x168] sm:$0xff] %vm284_vm0, %v265_v12  ;;  %331 = vst.msk [vmem:[%s964_s3 + $0x170] sm:$0xff] %vm284_vm0, %v266_v13  ;;  %v139_v23 = vmul.f32 %v381_v1, %v68_v10  ;;  %v205_v24 = vadd.f32 %v386_v2, %v134_v17  ;;  %v206_v25 = vadd.f32 %v386_v2, %v135_v18 }
  0x2c   :  { %332 = vst.msk [vmem:[%s964_s3 + $0x178] sm:$0xff] %vm284_vm0, %v267_v16  ;;  %v207_v26 = vadd.f32 %v386_v2, %v136_v19  ;;  %v140_v27 = vmul.f32 %v381_v1, %v69_v15  ;;  %v268_v29 = vmax.f32 %v204_v20, 0.0  ;;  %v208_v30 = vadd.f32 %v386_v2, %v137_v21 }
  0x2d   :  { %v209_v31 = vadd.f32 %v386_v2, %v138_v22  ;;  %v210_v32 = vadd.f32 %v386_v2, %v139_v23  ;;  %v269_v36 = vmax.f32 %v205_v24, 0.0  ;;  %v270_v37 = vmax.f32 %v206_v25, 0.0 }
  0x2e   :  { %v271_v38 = vmax.f32 %v207_v26, 0.0  ;;  %v211_v39 = vadd.f32 %v386_v2, %v140_v27  ;;  %333 = vst.msk [vmem:[%s964_s3 + $0x180] sm:$0xff] %vm284_vm0, %v268_v29  ;;  %v272_v43 = vmax.f32 %v208_v30, 0.0  ;;  %v141_v46 = vmul.f32 %v381_v1, %v70_v28 }
  0x2f   :  { %v273_v44 = vmax.f32 %v209_v31, 0.0  ;;  %v274_v45 = vmax.f32 %v210_v32, 0.0  ;;  %334 = vst.msk [vmem:[%s964_s3 + $0x188] sm:$0xff] %vm284_vm0, %v269_v36  ;;  %335 = vst.msk [vmem:[%s964_s3 + $0x190] sm:$0xff] %vm284_vm0, %v270_v37  ;;  %v142_v49 = vmul.f32 %v381_v1, %v71_v33  ;;  %v143_v50 = vmul.f32 %v381_v1, %v72_v34 }
  0x30   :  { %336 = vst.msk [vmem:[%s964_s3 + $0x198] sm:$0xff] %vm284_vm0, %v271_v38  ;;  %v275_v48 = vmax.f32 %v211_v39, 0.0  ;;  %v144_v51 = vmul.f32 %v381_v1, %v73_v35  ;;  %337 = vst.msk [vmem:[%s964_s3 + $0x1a0] sm:$0xff] %vm284_vm0, %v272_v43  ;;  %v212_v52 = vadd.f32 %v386_v2, %v141_v46  ;;  %v145_v53 = vmul.f32 %v381_v1, %v74_v40 }
  0x31   :  { %338 = vst.msk [vmem:[%s964_s3 + $0x1a8] sm:$0xff] %vm284_vm0, %v273_v44  ;;  %339 = vst.msk [vmem:[%s964_s3 + $0x1b0] sm:$0xff] %vm284_vm0, %v274_v45  ;;  %v146_v54 = vmul.f32 %v381_v1, %v75_v41  ;;  %v147_v55 = vmul.f32 %v381_v1, %v76_v42  ;;  %v213_v56 = vadd.f32 %v386_v2, %v142_v49 }
  0x32   :  { %340 = vst.msk [vmem:[%s964_s3 + $0x1b8] sm:$0xff] %vm284_vm0, %v275_v48  ;;  %v214_v57 = vadd.f32 %v386_v2, %v143_v50  ;;  %v215_v58 = vadd.f32 %v386_v2, %v144_v51  ;;  %v148_v59 = vmul.f32 %v381_v1, %v77_v47  ;;  %v276_v60 = vmax.f32 %v212_v52, 0.0 }
  0x33   :  { %v216_v61 = vadd.f32 %v386_v2, %v145_v53  ;;  %v217_v62 = vadd.f32 %v386_v2, %v146_v54  ;;  %v218_v63 = vadd.f32 %v386_v2, %v147_v55  ;;  %v277_v0 = vmax.f32 %v213_v56, 0.0 }
  0x34   :  { %v278_v3 = vmax.f32 %v214_v57, 0.0  ;;  %v279_v4 = vmax.f32 %v215_v58, 0.0  ;;  %v219_v5 = vadd.f32 %v386_v2, %v148_v59  ;;  %341 = vst.msk [vmem:[%s964_s3 + $0x1c0] sm:$0xff] %vm284_vm0, %v276_v60 }
  0x35   :  { %v280_v6 = vmax.f32 %v216_v61, 0.0  ;;  %v281_v7 = vmax.f32 %v217_v62, 0.0  ;;  %v282_v1 = vmax.f32 %v218_v63, 0.0  ;;  %342 = vst.msk [vmem:[%s964_s3 + $0x1c8] sm:$0xff] %vm284_vm0, %v277_v0 }
  0x36   :  { %343 = vst.msk [vmem:[%s964_s3 + $0x1d0] sm:$0xff] %vm284_vm0, %v278_v3  ;;  %344 = vst.msk [vmem:[%s964_s3 + $0x1d8] sm:$0xff] %vm284_vm0, %v279_v4  ;;  %v283_v2 = vmax.f32 %v219_v5, 0.0 }
  0x37   :  { %345 = vst.msk [vmem:[%s964_s3 + $0x1e0] sm:$0xff] %vm284_vm0, %v280_v6  ;;  %346 = vst.msk [vmem:[%s964_s3 + $0x1e8] sm:$0xff] %vm284_vm0, %v281_v7 }
  0x38   :  { %347 = vst.msk [vmem:[%s964_s3 + $0x1f0] sm:$0xff] %vm284_vm0, %v282_v1  ;;  %348 = vst.msk [vmem:[%s964_s3 + $0x1f8] sm:$0xff] %vm284_vm0, %v283_v2 }

// kernel: batchnorm_relu.2
= control target key start
LH: loop header
LB: loop body
LE: loop exit
PB: predicated region body
PF: predicated region fallthrough
CT: control target
= control target key end

     0   :  { %vm14_vm0 = vcmask 24576   ;;  %vm82_vm1 = vcmask 31744   ;;  %v428_v0 = vmov 0.0   ;;  %s1318_s0 = inlined_call_operand.vmem [shape: f32[512,4], index: 0, kind: input, shape index: {}]   ;;  %s1319_s1 = inlined_call_operand.vmem [shape: f32[1,4], index: 1, kind: output, shape index: {0}]   ;;  %s1320_s2 = inlined_call_operand.vmem [shape: f32[1,4], index: 2, kind: output, shape index: {1}]  }
   0x1   :  { %15 = vst.msk [vmem:[%s1319_s1] sm:$0x1] %vm14_vm0, %v428_v0  ;;  %16 = vst.msk [vmem:[%s1320_s2] sm:$0x1] %vm14_vm0, %v428_v0  ;;  %v455_v1 = vld [vmem:[%s1318_s0] sm:$0xff]  ;;  %v460_v2 = vld [vmem:[%s1318_s0 + $0x8] sm:$0xff] }
   0x2   :  { %v465_v3 = vld [vmem:[%s1318_s0 + $0x10] sm:$0xff]  ;;  %v83_v4 = vsel %vm82_vm1, %v455_v1, 0.0  ;;  %v84_v5 = vsel %vm82_vm1, %v460_v2, 0.0  ;;  %v476_v7 = vld [vmem:[%s1318_s0 + $0x18] sm:$0xff]  ;;  %v483_v10 = vld [vmem:[%s1318_s0 + $0x20] sm:$0xff] }
   0x3   :  { %v86_v6 = vsel %vm82_vm1, %v465_v3, 0.0  ;;  %v85_v8 = vadd.f32 %v84_v5, %v83_v4  ;;  %v88_v9 = vsel %vm82_vm1, %v476_v7, 0.0  ;;  %v90_v12 = vsel %vm82_vm1, %v483_v10, 0.0  ;;  %v490_v13 = vld [vmem:[%s1318_s0 + $0x28] sm:$0xff]  ;;  %v497_v16 = vld [vmem:[%s1318_s0 + $0x30] sm:$0xff]  ;;  %v502_v18 = vld [vmem:[%s1318_s0 + $0x38] sm:$0xff] }
   0x4   :  { %v92_v15 = vsel %vm82_vm1, %v490_v13, 0.0  ;;  %v507_v19 = vld [vmem:[%s1318_s0 + $0x40] sm:$0xff]  ;;  %v94_v20 = vsel %vm82_vm1, %v497_v16, 0.0  ;;  %v514_v21 = vld [vmem:[%s1318_s0 + $0x48] sm:$0xff]  ;;  %v519_v22 = vld [vmem:[%s1318_s0 + $0x50] sm:$0xff]  ;;  %v96_v25 = vsel %vm82_vm1, %v502_v18, 0.0 }
   0x5   :  { %v87_v11 = vadd.f32 %v86_v6, %v85_v8  ;;  %v524_v23 = vld [vmem:[%s1318_s0 + $0x58] sm:$0xff]  ;;  %v98_v26 = vsel %vm82_vm1, %v507_v19, 0.0  ;;  %v533_v27 = vld [vmem:[%s1318_s0 + $0x108] sm:$0xff]  ;;  %v538_v28 = vld [vmem:[%s1318_s0 + $0x110] sm:$0xff]  ;;  %v100_v30 = vsel %vm82_vm1, %v514_v21, 0.0  ;;  %v102_v31 = vsel %vm82_vm1, %v519_v22, 0.0 }
   0x6   :  { %v543_v29 = vld [vmem:[%s1318_s0 + $0x118] sm:$0xff]  ;;  %v551_v32 = vsel %vm82_vm1, %v524_v23, 0.0  ;;  %v556_v33 = vld [vmem:[%s1318_s0 + $0x120] sm:$0xff]  ;;  %v561_v34 = vld [vmem:[%s1318_s0 + $0x128] sm:$0xff]  ;;  %v570_v37 = vsel %vm82_vm1, %v533_v27, 0.0  ;;  %v574_v38 = vsel %vm82_vm1, %v538_v28, 0.0 }
   0x7   :  { %v89_v14 = vadd.f32 %v88_v9, %v87_v11  ;;  %v566_v35 = vld [vmem:[%s1318_s0 + $0x130] sm:$0xff]  ;;  %1339 = vst [vmem:[#allocation2_spill] sm:$0xff] %v570_v37  ;;  %1340 = vst [vmem:[#allocation3_spill] sm:$0xff] %v574_v38  ;;  %v578_v39 = vsel %vm82_vm1, %v543_v29, 0.0  ;;  %v583_v40 = vld [vmem:[%s1318_s0 + $0x138] sm:$0xff]  ;;  %v597_v43 = vsel %vm82_vm1, %v556_v33, 0.0  ;;  %v222_v37 = vmul.f32 %v465_v3, %v465_v3 }
   0x8   :  { %1341 = vst [vmem:[#allocation4_spill] sm:$0xff] %v578_v39  ;;  %v588_v41 = vld [vmem:[%s1318_s0 + $0x140] sm:$0xff]  ;;  %v593_v42 = vld [vmem:[%s1318_s0 + $0x148] sm:$0xff]  ;;  %1342 = vst [vmem:[#allocation5_spill] sm:$0xff] %v597_v43  ;;  %v601_v44 = vsel %vm82_vm1, %v561_v34, 0.0  ;;  %v605_v45 = vsel %vm82_vm1, %v566_v35, 0.0 }
   0x9   :  { %v91_v17 = vadd.f32 %v90_v12, %v89_v14  ;;  %1343 = vst [vmem:[#allocation6_spill] sm:$0xff] %v601_v44  ;;  %1344 = vst [vmem:[#allocation7_spill] sm:$0xff] %v605_v45  ;;  %v610_v46 = vld [vmem:[%s1318_s0 + $0x150] sm:$0xff]  ;;  %v615_v47 = vld [vmem:[%s1318_s0 + $0x158] sm:$0xff]  ;;  %v624_v50 = vsel %vm82_vm1, %v583_v40, 0.0  ;;  %v628_v51 = vsel %vm82_vm1, %v588_v41, 0.0 }
   0xa   :  { %v620_v48 = vld [vmem:[%s1318_s0 + $0x160] sm:$0xff]  ;;  %1345 = vst [vmem:[#allocation8_spill] sm:$0xff] %v624_v50  ;;  %1346 = vst [vmem:[#allocation9_spill] sm:$0xff] %v628_v51  ;;  %v632_v52 = vsel %vm82_vm1, %v593_v42, 0.0  ;;  %v637_v53 = vld [vmem:[%s1318_s0 + $0x168] sm:$0xff]  ;;  %v651_v56 = vsel %vm82_vm1, %v610_v46, 0.0 }
   0xb   :  { %v93_v24 = vadd.f32 %v92_v15, %v91_v17  ;;  %1347 = vst [vmem:[#allocation10_spill] sm:$0xff] %v632_v52  ;;  %v642_v54 = vld [vmem:[%s1318_s0 + $0x170] sm:$0xff]  ;;  %v647_v55 = vld [vmem:[%s1318_s0 + $0x178] sm:$0xff]  ;;  %1348 = vst [vmem:[#allocation11_spill] sm:$0xff] %v651_v56  ;;  %v655_v57 = vsel %vm82_vm1, %v615_v47, 0.0  ;;  %v659_v58 = vsel %vm82_vm1, %v620_v48, 0.0 }
   0xc   :  { %1349 = vst [vmem:[#allocation12_spill] sm:$0xff] %v655_v57  ;;  %1350 = vst [vmem:[#allocation13_spill] sm:$0xff] %v659_v58  ;;  %v664_v59 = vld [vmem:[%s1318_s0 + $0x180] sm:$0xff]  ;;  %v669_v60 = vld [vmem:[%s1318_s0 + $0x188] sm:$0xff]  ;;  %v678_v63 = vsel %vm82_vm1, %v637_v53, 0.0  ;;  %v682_v0 = vsel %vm82_vm1, %v642_v54, 0.0 }
   0xd   :  { %v95_v36 = vadd.f32 %v94_v20, %v93_v24  ;;  %v674_v61 = vld [vmem:[%s1318_s0 + $0x190] sm:$0xff]  ;;  %1351 = vst [vmem:[#allocation14_spill] sm:$0xff] %v678_v63  ;;  %1352 = vst [vmem:[#allocation15_spill] sm:$0xff] %v682_v0  ;;  %v686_v4 = vsel %vm82_vm1, %v647_v55, 0.0  ;;  %v691_v5 = vld [vmem:[%s1318_s0 + $0x198] sm:$0xff]  ;;  %v705_v9 = vsel %vm82_vm1, %v664_v59, 0.0 }
   0xe   :  { %1353 = vst [vmem:[#allocation16_spill] sm:$0xff] %v686_v4  ;;  %v696_v6 = vld [vmem:[%s1318_s0 + $0x1a0] sm:$0xff]  ;;  %v701_v8 = vld [vmem:[%s1318_s0 + $0x1a8] sm:$0xff]  ;;  %1354 = vst [vmem:[#allocation17_spill] sm:$0xff] %v705_v9  ;;  %v709_v11 = vsel %vm82_vm1, %v669_v60, 0.0  ;;  %v713_v12 = vsel %vm82_vm1, %v674_v61, 0.0 }
   0xf   :  { %v97_v49 = vadd.f32 %v96_v25, %v95_v36  ;;  %1355 = vst [vmem:[#allocation18_spill] sm:$0xff] %v709_v11  ;;  %1356 = vst [vmem:[#allocation19_spill] sm:$0xff] %v713_v12  ;;  %v718_v14 = vld [vmem:[%s1318_s0 + $0x60] sm:$0xff]  ;;  %v723_v15 = vld [vmem:[%s1318_s0 + $0x1b0] sm:$0xff]  ;;  %v737_v25 = vsel %vm82_vm1, %v691_v5, 0.0  ;;  %v745_v36 = vsel %vm82_vm1, %v701_v8, 0.0 }
  0x10   :  { %v728_v17 = vld [vmem:[%s1318_s0 + $0x1b8] sm:$0xff]  ;;  %v733_v20 = vld [vmem:[%s1318_s0 + $0x1c0] sm:$0xff]  ;;  %1357 = vst [vmem:[#allocation20_spill] sm:$0xff] %v737_v25  ;;  %1359 = vst [vmem:[#allocation22_spill] sm:$0xff] %v745_v36 }
  0x11   :  { %v99_v62 = vadd.f32 %v98_v26, %v97_v49  ;;  %v741_v26 = vsel %vm82_vm1, %v696_v6, 0.0  ;;  %v750_v49 = vld [vmem:[%s1318_s0 + $0x1c8] sm:$0xff]  ;;  %v768_v36 = vsel %vm82_vm1, %v728_v17, 0.0  ;;  %v772_v25 = vsel %vm82_vm1, %v733_v20, 0.0  ;;  %v777_v12 = vld [vmem:[%s1318_s0 + $0x1e0] sm:$0xff]  ;;  %v804_v0 = vld [vmem:[%s1318_s0 + $0x1f8] sm:$0xff] }
  0x12   :  { %1358 = vst [vmem:[#allocation21_spill] sm:$0xff] %v741_v26  ;;  %v764_v26 = vsel %vm82_vm1, %v723_v15, 0.0  ;;  %1361 = vst [vmem:[#allocation24_spill] sm:$0xff] %v768_v36  ;;  %v782_v11 = vld [vmem:[%s1318_s0 + $0x1e8] sm:$0xff]  ;;  %v791_v9 = vsel %vm82_vm1, %v750_v49, 0.0  ;;  %v826_v58 = vsel %vm82_vm1, %v804_v0, 0.0 }
  0x13   :  { %v101_v24 = vadd.f32 %v100_v30, %v99_v62  ;;  %v755_v30 = vld [vmem:[%s1318_s0 + $0x1d0] sm:$0xff]  ;;  %v760_v62 = vld [vmem:[%s1318_s0 + $0x1d8] sm:$0xff]  ;;  %1360 = vst [vmem:[#allocation23_spill] sm:$0xff] %v764_v26  ;;  %1362 = vst [vmem:[#allocation25_spill] sm:$0xff] %v772_v25 }
  0x14   :  { %v787_v26 = vld [vmem:[%s1318_s0 + $0x1f0] sm:$0xff]  ;;  %1364 = vst [vmem:[#allocation27_spill] sm:$0xff] %v791_v9  ;;  %v795_v25 = vsel %vm82_vm1, %v755_v30, 0.0  ;;  %v799_v4 = vsel %vm82_vm1, %v760_v62, 0.0  ;;  %1367 = vst [vmem:[#allocation30_spill] sm:$0xff] %v804_v0  ;;  %v814_v9 = vsel %vm82_vm1, %v782_v11, 0.0 }
  0x15   :  { %1363 = vst [vmem:[#allocation26_spill] sm:$0xff] %v787_v26  ;;  %v103_v36 = vadd.f32 %v102_v31, %v101_v24  ;;  %1365 = vst [vmem:[#allocation28_spill] sm:$0xff] %v795_v25  ;;  %v106_v31 = vsel %vm82_vm1, %v718_v14, 0.0  ;;  %v810_v24 = vsel %vm82_vm1, %v777_v12, 0.0  ;;  %v818_v25 = vsel %vm82_vm1, %v787_v26, 0.0  ;;  %v855_v56 = vld [vmem:[%s1318_s0 + $0x90] sm:$0xff] }
  0x16   :  { %1366 = vst [vmem:[#allocation29_spill] sm:$0xff] %v799_v4  ;;  %1368 = vst [vmem:[#allocation31_spill] sm:$0xff] %v810_v24  ;;  %v30_v4 = vld [vmem:[%s1318_s0 + $0x68] sm:$0xff]  ;;  %v860_v52 = vld [vmem:[%s1318_s0 + $0x98] sm:$0xff] }
  0x17   :  { %1369 = vst [vmem:[#allocation32_spill] sm:$0xff] %v814_v9  ;;  %1370 = vst [vmem:[#allocation33_spill] sm:$0xff] %v818_v25  ;;  %v105_v63 = vadd.f32 %v551_v32, %v103_v36  ;;  %v108_v24 = vsel %vm82_vm1, %v30_v4, 0.0  ;;  %v31_v9 = vld [vmem:[%s1318_s0 + $0x70] sm:$0xff]  ;;  %v835_v25 = vld [vmem:[%s1318_s0 + $0x78] sm:$0xff]  ;;  %v120_v39 = vsel %vm82_vm1, %v860_v52, 0.0 }
  0x18   :  { %1371 = vst [vmem:[#allocation34_spill] sm:$0xff] %v826_v58  ;;  %1372 = vst [vmem:[#allocation35_spill] sm:$0xff] %v835_v25  ;;  %v840_v32 = vld [vmem:[%s1318_s0 + $0x80] sm:$0xff]  ;;  %v845_v36 = vld [vmem:[%s1318_s0 + $0x88] sm:$0xff]  ;;  %v110_v58 = vsel %vm82_vm1, %v31_v9, 0.0 }
  0x19   :  { %v107_v57 = vadd.f32 %v106_v31, %v105_v63  ;;  %1373 = vst [vmem:[#allocation36_spill] sm:$0xff] %v840_v32  ;;  %1374 = vst [vmem:[#allocation37_spill] sm:$0xff] %v845_v36  ;;  %v220_v63 = vmul.f32 %v455_v1, %v455_v1  ;;  %v221_v31 = vmul.f32 %v460_v2, %v460_v2  ;;  %v865_v51 = vld [vmem:[%s1318_s0 + $0xa0] sm:$0xff]  ;;  %v112_v1 = vsel %vm82_vm1, %v835_v25, 0.0  ;;  %v876_v44 = vld [vmem:[%s1318_s0 + $0xa8] sm:$0xff] }
  0x1a   :  { %1375 = vst [vmem:[#allocation38_spill] sm:$0xff] %v855_v56  ;;  %1376 = vst [vmem:[#allocation39_spill] sm:$0xff] %v860_v52  ;;  %v114_v2 = vsel %vm82_vm1, %v840_v32, 0.0  ;;  %v116_v45 = vsel %vm82_vm1, %v845_v36, 0.0  ;;  %v881_v43 = vld [vmem:[%s1318_s0 + $0xb0] sm:$0xff]  ;;  %v122_v38 = vsel %vm82_vm1, %v865_v51, 0.0  ;;  %v223_v25 = vmul.f32 %v476_v7, %v476_v7 }
  0x1b   :  { %1377 = vst [vmem:[#allocation40_spill] sm:$0xff] %v865_v51  ;;  %v109_v50 = vadd.f32 %v108_v24, %v107_v57  ;;  %1378 = vst [vmem:[#allocation41_spill] sm:$0xff] %v876_v44  ;;  %v886_v57 = vld [vmem:[%s1318_s0 + $0xb8] sm:$0xff]  ;;  %v118_v24 = vsel %vm82_vm1, %v855_v56, 0.0  ;;  %v899_v36 = vld [vmem:[%s1318_s0 + $0xc0] sm:$0xff]  ;;  %v124_v51 = vsel %vm82_vm1, %v876_v44, 0.0 }
  0x1c   :  { %1379 = vst [vmem:[#allocation42_spill] sm:$0xff] %v881_v43  ;;  %1380 = vst [vmem:[#allocation43_spill] sm:$0xff] %v886_v57  ;;  %v904_v32 = vld [vmem:[%s1318_s0 + $0xc8] sm:$0xff]  ;;  %v909_v52 = vld [vmem:[%s1318_s0 + $0xd0] sm:$0xff]  ;;  %v915_v3 = vsel %vm82_vm1, %v881_v43, 0.0 }
  0x1d   :  { %1381 = vst [vmem:[#allocation44_spill] sm:$0xff] %v899_v36  ;;  %1382 = vst [vmem:[#allocation45_spill] sm:$0xff] %v904_v32  ;;  %v111_v56 = vadd.f32 %v110_v58, %v109_v50  ;;  %v922_v0 = vld [vmem:[%s1318_s0 + $0xd8] sm:$0xff]  ;;  %v927_v26 = vld [vmem:[%s1318_s0 + $0xe0] sm:$0xff]  ;;  %v931_v50 = vsel %vm82_vm1, %v886_v57, 0.0  ;;  %v935_v58 = vsel %vm82_vm1, %v899_v36, 0.0 }
  0x1e   :  { %1383 = vst [vmem:[#allocation46_spill] sm:$0xff] %v909_v52  ;;  %1384 = vst [vmem:[#allocation47_spill] sm:$0xff] %v922_v0  ;;  %v939_v7 = vsel %vm82_vm1, %v904_v32, 0.0  ;;  %v943_v43 = vsel %vm82_vm1, %v909_v52, 0.0  ;;  %v948_v44 = vld [vmem:[%s1318_s0 + $0xe8] sm:$0xff]  ;;  %v953_v57 = vld [vmem:[%s1318_s0 + $0xf0] sm:$0xff]  ;;  %v224_v52 = vmul.f32 %v483_v10, %v483_v10  ;;  %v228_v10 = vmul.f32 %v507_v19, %v507_v19 }
  0x1f   :  { %1385 = vst [vmem:[#allocation48_spill] sm:$0xff] %v927_v26  ;;  %1386 = vst [vmem:[#allocation49_spill] sm:$0xff] %v935_v58  ;;  %v113_v36 = vadd.f32 %v112_v1, %v111_v56  ;;  %v957_v58 = vsel %vm82_vm1, %v922_v0, 0.0  ;;  %v961_v32 = vsel %vm82_vm1, %v927_v26, 0.0  ;;  %v225_v56 = vmul.f32 %v490_v13, %v490_v13 }
  0x20   :  { %1387 = vst [vmem:[#allocation50_spill] sm:$0xff] %v939_v7  ;;  %1388 = vst [vmem:[#allocation51_spill] sm:$0xff] %v943_v43  ;;  %v967_v43 = vsel %vm82_vm1, %v948_v44, 0.0  ;;  %v971_v7 = vsel %vm82_vm1, %v953_v57, 0.0  ;;  %v226_v1 = vmul.f32 %v497_v16, %v497_v16  ;;  %v227_v26 = vmul.f32 %v502_v18, %v502_v18 }
  0x21   :  { %1389 = vst [vmem:[#allocation52_spill] sm:$0xff] %v948_v44  ;;  %1390 = vst [vmem:[#allocation53_spill] sm:$0xff] %v953_v57  ;;  %v115_v0 = vadd.f32 %v114_v2, %v113_v36  ;;  %v229_v44 = vmul.f32 %v514_v21, %v514_v21  ;;  %v230_v57 = vmul.f32 %v519_v22, %v519_v22 }
  0x22   :  { %1391 = vst [vmem:[#allocation54_spill] sm:$0xff] %v971_v7  ;;  %v231_v7 = vmul.f32 %v524_v23, %v524_v23  ;;  %v232_v13 = vmul.f32 %v718_v14, %v718_v14  ;;  %v989_v16 = vmul.f32 %v30_v4, %v30_v4  ;;  %v991_v2 = vmul.f32 %v31_v9, %v31_v9 }
  0x23   :  { %v117_v36 = vadd.f32 %v116_v45, %v115_v0  ;;  %v253_v18 = vmul.f32 %v533_v27, %v533_v27  ;;  %v254_v19 = vmul.f32 %v538_v28, %v538_v28  ;;  %v255_v21 = vmul.f32 %v543_v29, %v543_v29 }
  0x24   :  { %v256_v22 = vmul.f32 %v556_v33, %v556_v33  ;;  %v257_v23 = vmul.f32 %v561_v34, %v561_v34  ;;  %v258_v45 = vmul.f32 %v566_v35, %v566_v35  ;;  %v259_v4 = vmul.f32 %v583_v40, %v583_v40 }
  0x25   :  { %v119_v0 = vadd.f32 %v118_v24, %v117_v36  ;;  %v260_v27 = vmul.f32 %v588_v41, %v588_v41  ;;  %v261_v28 = vmul.f32 %v593_v42, %v593_v42  ;;  %v262_v29 = vmul.f32 %v610_v46, %v610_v46 }
  0x26   :  { %v263_v33 = vmul.f32 %v615_v47, %v615_v47  ;;  %v284_v34 = vsel %vm82_vm1, %v220_v63, 0.0  ;;  %v285_v35 = vsel %vm82_vm1, %v221_v31, 0.0  ;;  %v264_v40 = vmul.f32 %v620_v48, %v620_v48 }
  0x27   :  { %v121_v9 = vadd.f32 %v120_v39, %v119_v0  ;;  %v286_v14 = vadd.f32 %v285_v35, %v284_v34  ;;  %v287_v41 = vsel %vm82_vm1, %v222_v37, 0.0  ;;  %v265_v42 = vmul.f32 %v637_v53, %v637_v53  ;;  %v1392_v0 = vld [vmem:[#allocation26_spill] sm:$0xff] }
  0x28   :  { %v266_v46 = vmul.f32 %v642_v54, %v642_v54  ;;  %v267_v47 = vmul.f32 %v647_v55, %v647_v55  ;;  %v289_v63 = vsel %vm82_vm1, %v223_v25, 0.0  ;;  %v268_v39 = vmul.f32 %v664_v59, %v664_v59  ;;  %v1393_v34 = vld [vmem:[#allocation30_spill] sm:$0xff] }
  0x29   :  { %v123_v24 = vadd.f32 %v122_v38, %v121_v9  ;;  %v269_v48 = vmul.f32 %v669_v60, %v669_v60  ;;  %v288_v31 = vadd.f32 %v287_v41, %v286_v14  ;;  %v270_v37 = vmul.f32 %v674_v61, %v674_v61  ;;  %v1394_v41 = vld [vmem:[#allocation49_spill] sm:$0xff] }
  0x2a   :  { %v271_v53 = vmul.f32 %v691_v5, %v691_v5  ;;  %v272_v54 = vmul.f32 %v696_v6, %v696_v6  ;;  %v291_v55 = vsel %vm82_vm1, %v224_v52, 0.0  ;;  %v273_v38 = vmul.f32 %v701_v8, %v701_v8 }
  0x2b   :  { %v125_v25 = vadd.f32 %v124_v51, %v123_v24  ;;  %v274_v59 = vmul.f32 %v723_v15, %v723_v15  ;;  %v290_v60 = vadd.f32 %v289_v63, %v288_v31  ;;  %v275_v36 = vmul.f32 %v728_v17, %v728_v17 }
  0x2c   :  { %v276_v61 = vmul.f32 %v733_v20, %v733_v20  ;;  %v277_v5 = vmul.f32 %v750_v49, %v750_v49  ;;  %v293_v6 = vsel %vm82_vm1, %v225_v56, 0.0  ;;  %v278_v52 = vmul.f32 %v755_v30, %v755_v30 }
  0x2d   :  { %v127_v51 = vadd.f32 %v915_v3, %v125_v25  ;;  %v279_v8 = vmul.f32 %v760_v62, %v760_v62  ;;  %v292_v15 = vadd.f32 %v291_v55, %v290_v60  ;;  %v280_v17 = vmul.f32 %v777_v12, %v777_v12  ;;  %v1396_v25 = vld [vmem:[#allocation51_spill] sm:$0xff] }
  0x2e   :  { %v281_v20 = vmul.f32 %v782_v11, %v782_v11  ;;  %v282_v49 = vmul.f32 %v1392_v0, %v1392_v0  ;;  %v295_v56 = vsel %vm82_vm1, %v226_v1, 0.0  ;;  %v283_v30 = vmul.f32 %v1393_v34, %v1393_v34  ;;  %v1398_v34 = vld [vmem:[#allocation54_spill] sm:$0xff] }
  0x2f   :  { %v129_v3 = vadd.f32 %v931_v50, %v127_v51  ;;  %v294_v35 = vadd.f32 %v293_v6, %v292_v15  ;;  %v297_v62 = vsel %vm82_vm1, %v227_v26, 0.0  ;;  %v299_v9 = vsel %vm82_vm1, %v228_v10, 0.0 }
  0x30   :  { %v301_v12 = vsel %vm82_vm1, %v229_v44, 0.0  ;;  %v303_v14 = vsel %vm82_vm1, %v230_v57, 0.0  ;;  %v305_v11 = vsel %vm82_vm1, %v231_v7, 0.0  ;;  %v307_v1 = vsel %vm82_vm1, %v232_v13, 0.0  ;;  %v1395_v7 = vld [vmem:[#allocation50_spill] sm:$0xff] }
  0x31   :  { %v131_v63 = vadd.f32 %v1394_v41, %v129_v3  ;;  %v296_v24 = vadd.f32 %v295_v56, %v294_v35  ;;  %v1072_v50 = vsel %vm82_vm1, %v253_v18, 0.0  ;;  %v1075_v31 = vsel %vm82_vm1, %v254_v19, 0.0  ;;  %v1397_v56 = vld [vmem:[#allocation35_spill] sm:$0xff] }
  0x32   :  { %v1078_v26 = vsel %vm82_vm1, %v255_v21, 0.0  ;;  %v1081_v44 = vsel %vm82_vm1, %v256_v22, 0.0  ;;  %v1084_v57 = vsel %vm82_vm1, %v257_v23, 0.0  ;;  %v1088_v13 = vsel %vm82_vm1, %v258_v45, 0.0 }
  0x33   :  { %v133_v10 = vadd.f32 %v1395_v7, %v131_v63  ;;  %v298_v55 = vadd.f32 %v297_v62, %v296_v24  ;;  %v1091_v18 = vsel %vm82_vm1, %v259_v4, 0.0  ;;  %v1094_v19 = vsel %vm82_vm1, %v260_v27, 0.0  ;;  %v1399_v62 = vld [vmem:[#allocation36_spill] sm:$0xff] }
  0x34   :  { %v1097_v21 = vsel %vm82_vm1, %v261_v28, 0.0  ;;  %v1100_v22 = vsel %vm82_vm1, %v262_v29, 0.0  ;;  %v1103_v23 = vsel %vm82_vm1, %v263_v33, 0.0  ;;  %v1107_v45 = vsel %vm82_vm1, %v264_v40, 0.0 }
  0x35   :  { %v135_v60 = vadd.f32 %v1396_v25, %v133_v10  ;;  %v300_v6 = vadd.f32 %v299_v9, %v298_v55  ;;  %v1110_v4 = vsel %vm82_vm1, %v265_v42, 0.0  ;;  %v1113_v27 = vsel %vm82_vm1, %v266_v46, 0.0  ;;  %v1401_v10 = vld [vmem:[#allocation38_spill] sm:$0xff] }
  0x36   :  { %v1116_v28 = vsel %vm82_vm1, %v267_v47, 0.0  ;;  %v1119_v29 = vsel %vm82_vm1, %v268_v39, 0.0  ;;  %v1122_v33 = vsel %vm82_vm1, %v269_v48, 0.0  ;;  %v1126_v40 = vsel %vm82_vm1, %v270_v37, 0.0  ;;  %v1402_v25 = vld [vmem:[#allocation2_spill] sm:$0xff] }
  0x37   :  { %v137_v51 = vadd.f32 %v957_v58, %v135_v60  ;;  %v302_v15 = vadd.f32 %v301_v12, %v300_v6  ;;  %v1129_v42 = vsel %vm82_vm1, %v271_v53, 0.0  ;;  %v1132_v46 = vsel %vm82_vm1, %v272_v54, 0.0 }
  0x38   :  { %v1135_v47 = vsel %vm82_vm1, %v273_v38, 0.0  ;;  %v1138_v39 = vsel %vm82_vm1, %v274_v59, 0.0  ;;  %v1141_v48 = vsel %vm82_vm1, %v275_v36, 0.0  ;;  %v1145_v37 = vsel %vm82_vm1, %v276_v61, 0.0 }
  0x39   :  { %v139_v58 = vadd.f32 %v961_v32, %v137_v51  ;;  %v304_v0 = vadd.f32 %v303_v14, %v302_v15  ;;  %v1148_v53 = vsel %vm82_vm1, %v277_v5, 0.0  ;;  %v1151_v54 = vsel %vm82_vm1, %v278_v52, 0.0  ;;  %v1165_v32 = vld [vmem:[%s1318_s0 + $0xf8] sm:$0xff]  ;;  %v1403_v51 = vld [vmem:[#allocation39_spill] sm:$0xff] }
  0x3a   :  { %v1154_v38 = vsel %vm82_vm1, %v279_v8, 0.0  ;;  %v1157_v59 = vsel %vm82_vm1, %v280_v17, 0.0  ;;  %v1160_v36 = vsel %vm82_vm1, %v281_v20, 0.0  ;;  %v1169_v52 = vsel %vm82_vm1, %v282_v49, 0.0 }
  0x3b   :  { %v141_v61 = vadd.f32 %v967_v43, %v139_v58  ;;  %v306_v5 = vadd.f32 %v305_v11, %v304_v0  ;;  %v1172_v8 = vsel %vm82_vm1, %v283_v30, 0.0  ;;  %v144_v17 = vsel %vm82_vm1, %v1165_v32, 0.0  ;;  %v1183_v43 = vld [vmem:[%s1318_s0 + $0x100] sm:$0xff]  ;;  %v1404_v58 = vld [vmem:[#allocation3_spill] sm:$0xff] }
  0x3c   :  { %v235_v20 = vmul.f32 %v1397_v56, %v1397_v56  ;;  %v309_v3 = vsel %vm82_vm1, %v989_v16, 0.0  ;;  %v146_v30 = vsel %vm82_vm1, %v1183_v43, 0.0  ;;  %v236_v9 = vmul.f32 %v1399_v62, %v1399_v62  ;;  %v1400_v16 = vld [vmem:[#allocation37_spill] sm:$0xff] }
  0x3d   :  { %v143_v49 = vadd.f32 %v1398_v34, %v141_v61  ;;  %v308_v35 = vadd.f32 %v307_v1, %v306_v5  ;;  %v311_v12 = vsel %vm82_vm1, %v991_v2, 0.0  ;;  %v237_v41 = vmul.f32 %v1400_v16, %v1400_v16  ;;  %v1405_v5 = vld [vmem:[#allocation40_spill] sm:$0xff]  ;;  %v1408_v62 = vld [vmem:[#allocation5_spill] sm:$0xff] }
  0x3e   :  { %v313_v63 = vsel %vm82_vm1, %v235_v20, 0.0  ;;  %v238_v1 = vmul.f32 %v1401_v10, %v1401_v10  ;;  %v315_v55 = vsel %vm82_vm1, %v236_v9, 0.0  ;;  %v239_v2 = vmul.f32 %v1403_v51, %v1403_v51  ;;  %v1406_v20 = vld [vmem:[#allocation4_spill] sm:$0xff] }
  0x3f   :  { %v145_v14 = vadd.f32 %v144_v17, %v143_v49  ;;  %v310_v11 = vadd.f32 %v309_v3, %v308_v35  ;;  %v317_v15 = vsel %vm82_vm1, %v237_v41, 0.0  ;;  %v240_v17 = vmul.f32 %v1405_v5, %v1405_v5  ;;  %v1407_v49 = vld [vmem:[#allocation41_spill] sm:$0xff]  ;;  %v1410_v41 = vld [vmem:[#allocation6_spill] sm:$0xff] }
  0x40   :  { %v319_v56 = vsel %vm82_vm1, %v238_v1, 0.0  ;;  %v241_v35 = vmul.f32 %v1407_v49, %v1407_v49 }
  0x41   :  { %v147_v24 = vadd.f32 %v146_v30, %v145_v14  ;;  %v312_v7 = vadd.f32 %v311_v12, %v310_v11  ;;  %v321_v30 = vsel %vm82_vm1, %v239_v2, 0.0  ;;  %v1409_v14 = vld [vmem:[#allocation42_spill] sm:$0xff]  ;;  %v323_v16 = vsel %vm82_vm1, %v240_v17, 0.0 }
  0x42   :  { %v242_v11 = vmul.f32 %v1409_v14, %v1409_v14  ;;  %v325_v1 = vsel %vm82_vm1, %v241_v35, 0.0 }
  0x43   :  { %v149_v60 = vadd.f32 %v1402_v25, %v147_v24  ;;  %v314_v6 = vadd.f32 %v313_v63, %v312_v7  ;;  %v1411_v7 = vld [vmem:[#allocation43_spill] sm:$0xff] }
  0x44   :  { %v243_v10 = vmul.f32 %v1411_v7, %v1411_v7  ;;  %v327_v2 = vsel %vm82_vm1, %v242_v11, 0.0 }
  0x45   :  { %v151_v0 = vadd.f32 %v1404_v58, %v149_v60  ;;  %v316_v61 = vadd.f32 %v315_v55, %v314_v6  ;;  %v1412_v55 = vld [vmem:[#allocation7_spill] sm:$0xff]  ;;  %v1413_v6 = vld [vmem:[#allocation44_spill] sm:$0xff] }
  0x46   :  { %v244_v51 = vmul.f32 %v1413_v6, %v1413_v6  ;;  %v329_v17 = vsel %vm82_vm1, %v243_v10, 0.0 }
  0x47   :  { %v153_v3 = vadd.f32 %v1406_v20, %v151_v0  ;;  %v318_v34 = vadd.f32 %v317_v15, %v316_v61  ;;  %v1414_v15 = vld [vmem:[#allocation8_spill] sm:$0xff]  ;;  %v1415_v61 = vld [vmem:[#allocation45_spill] sm:$0xff] }
  0x48   :  { %v245_v5 = vmul.f32 %v1415_v61, %v1415_v61  ;;  %v331_v35 = vsel %vm82_vm1, %v244_v51, 0.0 }
  0x49   :  { %v155_v9 = vadd.f32 %v1408_v62, %v153_v3  ;;  %v320_v12 = vadd.f32 %v319_v56, %v318_v34  ;;  %v1416_v56 = vld [vmem:[#allocation9_spill] sm:$0xff]  ;;  %v1417_v34 = vld [vmem:[#allocation46_spill] sm:$0xff] }
  0x4a   :  { %v246_v49 = vmul.f32 %v1417_v34, %v1417_v34  ;;  %v333_v11 = vsel %vm82_vm1, %v245_v5, 0.0 }
  0x4b   :  { %v157_v63 = vadd.f32 %v1410_v41, %v155_v9  ;;  %v322_v24 = vadd.f32 %v321_v30, %v320_v12  ;;  %v1418_v30 = vld [vmem:[#allocation10_spill] sm:$0xff]  ;;  %v1419_v12 = vld [vmem:[#allocation47_spill] sm:$0xff] }
  0x4c   :  { %v247_v14 = vmul.f32 %v1419_v12, %v1419_v12  ;;  %v335_v10 = vsel %vm82_vm1, %v246_v49, 0.0  ;;  %v1427_v49 = vld [vmem:[#allocation15_spill] sm:$0xff]  ;;  %v1428_v12 = vld [vmem:[#allocation16_spill] sm:$0xff] }
  0x4d   :  { %v159_v25 = vadd.f32 %v1412_v55, %v157_v63  ;;  %v324_v60 = vadd.f32 %v323_v16, %v322_v24  ;;  %v1420_v16 = vld [vmem:[#allocation11_spill] sm:$0xff]  ;;  %v1421_v24 = vld [vmem:[#allocation48_spill] sm:$0xff] }
  0x4e   :  { %v248_v7 = vmul.f32 %v1421_v24, %v1421_v24  ;;  %v337_v51 = vsel %vm82_vm1, %v247_v14, 0.0 }
  0x4f   :  { %v161_v58 = vadd.f32 %v1414_v15, %v159_v25  ;;  %v326_v0 = vadd.f32 %v325_v1, %v324_v60  ;;  %v1422_v1 = vld [vmem:[#allocation12_spill] sm:$0xff] }
  0x50   :  { %v1423_v60 = vld [vmem:[#allocation52_spill] sm:$0xff]  ;;  %v339_v5 = vsel %vm82_vm1, %v248_v7, 0.0  ;;  %v1430_v7 = vld [vmem:[#allocation18_spill] sm:$0xff] }
  0x51   :  { %v163_v20 = vadd.f32 %v1416_v56, %v161_v58  ;;  %v328_v3 = vadd.f32 %v327_v2, %v326_v0  ;;  %v249_v6 = vmul.f32 %v1423_v60, %v1423_v60  ;;  %v1424_v2 = vld [vmem:[#allocation13_spill] sm:$0xff] }
  0x52   :  { %v1425_v0 = vld [vmem:[#allocation53_spill] sm:$0xff] }
  0x53   :  { %v165_v62 = vadd.f32 %v1418_v30, %v163_v20  ;;  %v330_v9 = vadd.f32 %v329_v17, %v328_v3  ;;  %v250_v61 = vmul.f32 %v1425_v0, %v1425_v0  ;;  %v1426_v17 = vld [vmem:[#allocation14_spill] sm:$0xff]  ;;  %v251_v3 = vmul.f32 %v1165_v32, %v1165_v32 }
  0x54   :  { %v341_v34 = vsel %vm82_vm1, %v249_v6, 0.0  ;;  %v1432_v6 = vld [vmem:[#allocation20_spill] sm:$0xff]  ;;  %v1434_v0 = vld [vmem:[#allocation22_spill] sm:$0xff] }
  0x55   :  { %v167_v41 = vadd.f32 %v1420_v16, %v165_v62  ;;  %v332_v63 = vadd.f32 %v331_v35, %v330_v9  ;;  %v252_v62 = vmul.f32 %v1183_v43, %v1183_v43  ;;  %v343_v9 = vsel %vm82_vm1, %v250_v61, 0.0 }
  0x56   :  { %v345_v16 = vsel %vm82_vm1, %v251_v3, 0.0  ;;  %v1436_v3 = vld [vmem:[#allocation24_spill] sm:$0xff] }
  0x57   :  { %v169_v55 = vadd.f32 %v1422_v1, %v167_v41  ;;  %v334_v25 = vadd.f32 %v333_v11, %v332_v63  ;;  %v1429_v41 = vld [vmem:[#allocation17_spill] sm:$0xff]  ;;  %v347_v32 = vsel %vm82_vm1, %v252_v62, 0.0  ;;  %v1438_v62 = vld [vmem:[#allocation27_spill] sm:$0xff] }
  0x59   :  { %v171_v15 = vadd.f32 %v1424_v2, %v169_v55  ;;  %v336_v58 = vadd.f32 %v335_v10, %v334_v25  ;;  %v1431_v55 = vld [vmem:[#allocation19_spill] sm:$0xff]  ;;  %v1433_v2 = vld [vmem:[#allocation21_spill] sm:$0xff] }
  0x5b   :  { %v173_v56 = vadd.f32 %v1426_v17, %v171_v15  ;;  %v338_v20 = vadd.f32 %v337_v51, %v336_v58  ;;  %v1435_v17 = vld [vmem:[#allocation23_spill] sm:$0xff] }
  0x5d   :  { %v175_v35 = vadd.f32 %v1427_v49, %v173_v56  ;;  %v340_v30 = vadd.f32 %v339_v5, %v338_v20 }
  0x5f   :  { %v177_v14 = vadd.f32 %v1428_v12, %v175_v35  ;;  %v342_v11 = vadd.f32 %v341_v34, %v340_v30  ;;  %v1437_v35 = vld [vmem:[#allocation25_spill] sm:$0xff]  ;;  %v1439_v12 = vld [vmem:[#allocation28_spill] sm:$0xff] }
  0x61   :  { %v179_v63 = vadd.f32 %v1429_v41, %v177_v14  ;;  %v344_v24 = vadd.f32 %v343_v9, %v342_v11  ;;  %v1440_v11 = vld [vmem:[#allocation29_spill] sm:$0xff]  ;;  %v1441_v41 = vld [vmem:[#allocation31_spill] sm:$0xff] }
  0x63   :  { %v181_v10 = vadd.f32 %v1430_v7, %v179_v63  ;;  %v346_v1 = vadd.f32 %v345_v16, %v344_v24  ;;  %v1442_v24 = vld [vmem:[#allocation32_spill] sm:$0xff]  ;;  %v1443_v7 = vld [vmem:[#allocation33_spill] sm:$0xff] }
  0x65   :  { %v183_v25 = vadd.f32 %v1431_v55, %v181_v10  ;;  %v348_v60 = vadd.f32 %v347_v32, %v346_v1  ;;  %v1444_v1 = vld [vmem:[#allocation34_spill] sm:$0xff] }
  0x67   :  { %v185_v43 = vadd.f32 %v1432_v6, %v183_v25  ;;  %v350_v51 = vadd.f32 %v1072_v50, %v348_v60 }
  0x69   :  { %v187_v15 = vadd.f32 %v1433_v2, %v185_v43  ;;  %v352_v58 = vadd.f32 %v1075_v31, %v350_v51 }
  0x6b   :  { %v189_v61 = vadd.f32 %v1434_v0, %v187_v15  ;;  %v354_v5 = vadd.f32 %v1078_v26, %v352_v58 }
  0x6d   :  { %v191_v56 = vadd.f32 %v1435_v17, %v189_v61  ;;  %v356_v20 = vadd.f32 %v1081_v44, %v354_v5 }
  0x6f   :  { %v193_v34 = vadd.f32 %v1436_v3, %v191_v56  ;;  %v358_v49 = vadd.f32 %v1084_v57, %v356_v20 }
  0x71   :  { %v195_v30 = vadd.f32 %v1437_v35, %v193_v34  ;;  %v360_v50 = vadd.f32 %v1088_v13, %v358_v49 }
  0x73   :  { %v197_v9 = vadd.f32 %v1438_v62, %v195_v30  ;;  %v362_v31 = vadd.f32 %v1091_v18, %v360_v50 }
  0x75   :  { %v199_v14 = vadd.f32 %v1439_v12, %v197_v9  ;;  %v364_v26 = vadd.f32 %v1094_v19, %v362_v31 }
  0x77   :  { %v201_v16 = vadd.f32 %v1440_v11, %v199_v14  ;;  %v366_v44 = vadd.f32 %v1097_v21, %v364_v26 }
  0x79   :  { %v203_v63 = vadd.f32 %v1441_v41, %v201_v16  ;;  %v368_v57 = vadd.f32 %v1100_v22, %v366_v44 }
  0x7b   :  { %v205_v32 = vadd.f32 %v1442_v24, %v203_v63  ;;  %v370_v13 = vadd.f32 %v1103_v23, %v368_v57 }
  0x7d   :  { %v207_v10 = vadd.f32 %v1443_v7, %v205_v32  ;;  %v372_v18 = vadd.f32 %v1107_v45, %v370_v13  ;;  %v81_v45 = vld [vmem:[%s1319_s1] sm:$0x1] }
  0x7f   :  { %v209_v55 = vadd.f32 %v1444_v1, %v207_v10  ;;  %v374_v19 = vadd.f32 %v1110_v4, %v372_v18 }
  0x81   :  { %v210_v25 = vrot.slane %v209_v55, 4  ;;  %v376_v60 = vadd.f32 %v1113_v27, %v374_v19 }
  0x83   :  { %v211_v21 = vadd.f32 %v210_v25, %v209_v55  ;;  %v378_v6 = vadd.f32 %v1116_v28, %v376_v60 }
  0x85   :  { %v212_v43 = vrot.slane %v211_v21, 2  ;;  %v380_v22 = vadd.f32 %v1119_v29, %v378_v6 }
  0x87   :  { %v213_v51 = vadd.f32 %v212_v43, %v211_v21  ;;  %v382_v23 = vadd.f32 %v1122_v33, %v380_v22 }
  0x89   :  { %v214_v2 = vrot.slane %v213_v51, 1  ;;  %v384_v15 = vadd.f32 %v1126_v40, %v382_v23 }
  0x8b   :  { %v215_v4 = vadd.f32 %v214_v2, %v213_v51  ;;  %v386_v58 = vadd.f32 %v1129_v42, %v384_v15 }
  0x8d   :  { %v216_v27 = vadd.f32 %v215_v4, %v81_v45  ;;  %v388_v0 = vadd.f32 %v1132_v46, %v386_v58 }
  0x8f   :  { %218 = vst.msk [vmem:[%s1319_s1] sm:$0x1] %vm14_vm0, %v216_v27  ;;  %v390_v28 = vadd.f32 %v1135_v47, %v388_v0 }
  0x91   :  { %v392_v29 = vadd.f32 %v1138_v39, %v390_v28 }
  0x93   :  { %v394_v33 = vadd.f32 %v1141_v48, %v392_v29 }
  0x95   :  { %v396_v40 = vadd.f32 %v1145_v37, %v394_v33  ;;  %v219_v37 = vld [vmem:[%s1320_s2] sm:$0x1] }
  0x97   :  { %v398_v61 = vadd.f32 %v1148_v53, %v396_v40 }
  0x99   :  { %v400_v42 = vadd.f32 %v1151_v54, %v398_v61 }
  0x9b   :  { %v402_v5 = vadd.f32 %v1154_v38, %v400_v42 }
  0x9d   :  { %v404_v46 = vadd.f32 %v1157_v59, %v402_v5 }
  0x9f   :  { %v406_v17 = vadd.f32 %v1160_v36, %v404_v46 }
  0xa1   :  { %v408_v56 = vadd.f32 %v1169_v52, %v406_v17 }
  0xa3   :  { %v410_v47 = vadd.f32 %v1172_v8, %v408_v56 }
  0xa5   :  { %v411_v20 = vrot.slane %v410_v47, 4 }
  0xa7   :  { %v412_v39 = vadd.f32 %v411_v20, %v410_v47 }
  0xa9   :  { %v413_v3 = vrot.slane %v412_v39, 2 }
  0xab   :  { %v414_v48 = vadd.f32 %v413_v3, %v412_v39 }
  0xad   :  { %v415_v34 = vrot.slane %v414_v48, 1 }
  0xaf   :  { %v416_v53 = vadd.f32 %v415_v34, %v414_v48 }
  0xb1   :  { %v417_v54 = vadd.f32 %v416_v53, %v219_v37 }
  0xb3   :  { %418 = vst.msk [vmem:[%s1320_s2] sm:$0x1] %vm14_vm0, %v417_v54 }

</bundles_post_ra>
